<compile_context>
chip_gen: v7x
topology: tpu7x:2x2x1
jax: 0.10.0
libtpu: 0.0.40
codegen_flags: <defaults>
</compile_context>

<pallas_src>
import functools

import jax
import jax.numpy as jnp
from jax import lax
from jax.experimental import pallas as pl
from jax.experimental.pallas import tpu as pltpu

_LANE = 128      # feature dims padded to the lane width
_SUBLANE = 8     # batch padded to the sublane width
_MAX_TT = 32     # max timesteps processed per grid step


def _round_up(x, m):
    return (x + m - 1) // m * m


# ---------------------------------------------------------------------------
# Kernel: one grid step == TT timesteps of the stacked LSTMCell recurrence.
# ---------------------------------------------------------------------------
def _lstm_seq_kernel(n_layers, hp, tt, t_total, needs_mask,
                     emb_ref, wx_ref, wh_ref, b_ref, h0_ref, c0_ref,
                     hs_ref, h_ref, c_ref):
    blk = pl.program_id(0)

    # h_ref / c_ref have a constant output index_map -> they stay VMEM-resident
    # across the whole grid and hold the recurrent state; HBM writeback happens
    # once, after the last grid step.
    @pl.when(blk == 0)
    def _():
        h_ref[...] = h0_ref[...]
        c_ref[...] = c0_ref[...]

    def step(s, carry):
        # Pre-embedded input for this timestep (already hidden-width, padded).
        x_b = emb_ref[s].astype(jnp.bfloat16)                   # (BP, HP)
        if needs_mask:
            valid = (blk * tt + s) < t_total

        h_last = None
        for layer in range(n_layers):
            h_prev = h_ref[layer]                               # (BP, HP) f32
            c_prev = c_ref[layer]                               # (BP, HP) f32
            # Two K=HP bf16 matmuls into one f32 accumulator (no concat).
            gates = (jnp.dot(x_b, wx_ref[layer],
                             preferred_element_type=jnp.float32)
                     + jnp.dot(h_prev.astype(jnp.bfloat16), wh_ref[layer],
                               preferred_element_type=jnp.float32)
                     + b_ref[layer])                            # (BP, 4*HP)
            # Each gate occupies its own lane-aligned 128-wide slab.
            i_g = jax.nn.sigmoid(gates[:, 0 * hp:1 * hp])
            f_g = jax.nn.sigmoid(gates[:, 1 * hp:2 * hp])
            g_g = jnp.tanh(gates[:, 2 * hp:3 * hp])
            o_g = jax.nn.sigmoid(gates[:, 3 * hp:4 * hp])
            c_new = f_g * c_prev + i_g * g_g
            h_new = o_g * jnp.tanh(c_new)
            if needs_mask:
                # Padded (beyond-T) steps must not advance the recurrence.
                c_new = jnp.where(valid, c_new, c_prev)
                h_new = jnp.where(valid, h_new, h_prev)
            h_ref[layer] = h_new
            c_ref[layer] = c_new
            x_b = h_new.astype(jnp.bfloat16)
            h_last = h_new

        hs_ref[s] = h_last         # last layer's h; output head applied outside
        return carry

    lax.fori_loop(0, tt, step, 0)


# ---------------------------------------------------------------------------
# Wrappers
# ---------------------------------------------------------------------------
def lstm_forward_seq(xs, kparams, hidden, output_size):
    """Run a T-step rollout with ONE pallas_call for the recurrence.

    xs:      (T, batch, input_size) f32
    kparams: output of prepare_params()
    hidden:  (h, c), each (n_layers, batch_pad, hidden_pad) f32 (see init_hidden)
    Returns (ys, new_hidden): ys is (T, batch, output_size) f32; new_hidden keeps
    the padded kernel layout so it can be fed straight back in.
    """
    emb_w, emb_b, w_x, w_h, b_cat, out_w, out_b = kparams
    h0, c0 = hidden
    T, B, In = xs.shape
    n_layers, BP, HP = h0.shape
    H = out_w.shape[0]
    del output_size  # implied by out_w

    TT = min(T, _MAX_TT)
    T_pad = pl.cdiv(T, TT) * TT
    needs_mask = (T_pad != T)

    # --- hoisted, non-recurrent embedding: one batched matmul over all steps ---
    emb = (jnp.dot(xs.reshape(T * B, In), emb_w) + emb_b).reshape(T, B, HP)
    emb = jnp.pad(emb, ((0, T_pad - T), (0, BP - B), (0, 0)))

    const = lambda a: pl.BlockSpec(a.shape, lambda t, _n=a.ndim: (0,) * _n)
    kernel = functools.partial(_lstm_seq_kernel, n_layers, HP, TT, T, needs_mask)

    hs_p, h_new, c_new = pl.pallas_call(
        kernel,
        grid=(T_pad // TT,),
        in_specs=[
            pl.BlockSpec((TT, BP, HP), lambda t: (t, 0, 0)),     # embedded, per block
            const(w_x), const(w_h), const(b_cat),
            const(h0), const(c0),
        ],
        out_specs=[
            pl.BlockSpec((TT, BP, HP), lambda t: (t, 0, 0)),     # last-layer h per step
            pl.BlockSpec(h0.shape, lambda t: (0, 0, 0)),         # resident h
            pl.BlockSpec(c0.shape, lambda t: (0, 0, 0)),         # resident c
        ],
        out_shape=(
            jax.ShapeDtypeStruct((T_pad, BP, HP), jnp.float32),
            jax.ShapeDtypeStruct(h0.shape, jnp.float32),
            jax.ShapeDtypeStruct(c0.shape, jnp.float32),
        ),
        # h0 -> h_out, c0 -> c_out: no fresh HBM state buffers on repeated calls.
        input_output_aliases={4: 1, 5: 2},
        compiler_params=pltpu.CompilerParams(
            dimension_semantics=("arbitrary",)),   # recurrence -> sequential grid
    )(emb, w_x, w_h, b_cat, h0, c0)

    # --- hoisted, non-recurrent output head: batched matmul + tanh ---
    h_last = hs_p[:T, :B, :H]                                    # (T, B, H)
    ys = jnp.tanh(h_last @ out_w + out_b)                        # (T, B, Out)
    return ys, (h_new, c_new)


def lstm_forward(x, kparams, hidden, output_size):
    """Single step: exact analogue of one nn.Module.forward call."""
    ys, hidden = lstm_forward_seq(x[None], kparams, hidden, output_size)
    return ys[0], hidden


# ---------------------------------------------------------------------------
# Parameters (PyTorch layout -> padded kernel layout)
# ---------------------------------------------------------------------------
def init_torch_params(key, input_size, output_size, hidden_size, n_layers):
    """Deterministic synthetic params with the PyTorch module's shapes/ranges."""
    ks = jax.random.split(key, 8)
    u = lambda k, shape, s: jax.random.uniform(k, shape, jnp.float32,
                                               minval=-s, maxval=s)
    s_in = 1.0 / (input_size ** 0.5)
    s_h = 1.0 / (hidden_size ** 0.5)
    emb_w = u(ks[0], (hidden_size, input_size), s_in)        # nn.Linear weight
    emb_b = u(ks[1], (hidden_size,), s_in)
    w_ih = u(ks[2], (n_layers, 4 * hidden_size, hidden_size), s_h)   # LSTMCell
    w_hh = u(ks[3], (n_layers, 4 * hidden_size, hidden_size), s_h)
    b_ih = u(ks[4], (n_layers, 4 * hidden_size), s_h)
    b_hh = u(ks[5], (n_layers, 4 * hidden_size), s_h)
    out_w = u(ks[6], (output_size, hidden_size), s_h)         # nn.Linear weight
    out_b = u(ks[7], (output_size,), s_h)
    return (emb_w, emb_b, w_ih, w_hh, b_ih, b_hh, out_w, out_b)


def prepare_params(torch_params):
    """Pad / transpose PyTorch-layout params into the kernel layout.

    * weights pre-transposed to (in, out) so everything computes x @ W + b
    * per-layer W_ih, W_hh kept separate (concat-free gate matmul in-kernel),
      each gate in its own lane-aligned 128-wide column slab; b_ih+b_hh pre-summed
    * gate matmul weights stored bf16 (f32 accumulation in-kernel)
    * embedding weight padded to HP lanes (embed runs outside the kernel);
      output-head weight kept unpadded (head runs outside the kernel)
    """
    emb_w, emb_b, w_ih, w_hh, b_ih, b_hh, out_w, out_b = torch_params
    H, In = emb_w.shape
    n_layers = w_ih.shape[0]
    HP = _round_up(H, _LANE)

    emb_w_k = jnp.zeros((In, HP), jnp.float32).at[:, :H].set(emb_w.T)
    emb_b_k = jnp.zeros((HP,), jnp.float32).at[:H].set(emb_b)

    w_x = jnp.zeros((n_layers, HP, 4 * HP), jnp.float32)
    w_h = jnp.zeros((n_layers, HP, 4 * HP), jnp.float32)
    b_cat = jnp.zeros((n_layers, 1, 4 * HP), jnp.float32)
    for g in range(4):                               # torch gate order: i, f, g, o
        wi_g = jnp.transpose(w_ih[:, g * H:(g + 1) * H, :], (0, 2, 1))   # (L,H,H)
        wh_g = jnp.transpose(w_hh[:, g * H:(g + 1) * H, :], (0, 2, 1))   # (L,H,H)
        w_x = w_x.at[:, :H, g * HP:g * HP + H].set(wi_g)
        w_h = w_h.at[:, :H, g * HP:g * HP + H].set(wh_g)
        b_cat = b_cat.at[:, 0, g * HP:g * HP + H].set(
            b_ih[:, g * H:(g + 1) * H] + b_hh[:, g * H:(g + 1) * H])

    out_w_k = out_w.T.astype(jnp.float32)            # (H, Out)
    out_b_k = out_b.astype(jnp.float32)

    return (emb_w_k, emb_b_k,
            w_x.astype(jnp.bfloat16), w_h.astype(jnp.bfloat16), b_cat,
            out_w_k, out_b_k)


def init_hidden(n_layers, batch_size, hidden_size):
    """Zero recurrent state, already in the padded kernel layout."""
    BP = _round_up(batch_size, _SUBLANE)
    HP = _round_up(hidden_size, _LANE)
    shape = (n_layers, BP, HP)
    return (jnp.zeros(shape, jnp.float32), jnp.zeros(shape, jnp.float32))


# ---------------------------------------------------------------------------
# Pure-JAX f32 reference (PyTorch semantics) for verification
# ---------------------------------------------------------------------------
def lstm_reference(xs, torch_params, hidden_size, n_layers):
    emb_w, emb_b, w_ih, w_hh, b_ih, b_hh, out_w, out_b = torch_params
    T, B, _ = xs.shape
    H = hidden_size
    prec = jax.lax.Precision.HIGHEST
    h = [jnp.zeros((B, H), jnp.float32) for _ in range(n_layers)]
    c = [jnp.zeros((B, H), jnp.float32) for _ in range(n_layers)]
    ys = []
    for t in range(T):
        h_in = jnp.dot(xs[t], emb_w.T, precision=prec) + emb_b
        for l in range(n_layers):
            gates = (jnp.dot(h_in, w_ih[l].T, precision=prec)
                     + jnp.dot(h[l], w_hh[l].T, precision=prec)
                     + b_ih[l] + b_hh[l])
            i = jax.nn.sigmoid(gates[:, 0 * H:1 * H])
            f = jax.nn.sigmoid(gates[:, 1 * H:2 * H])
            g = jnp.tanh(gates[:, 2 * H:3 * H])
            o = jax.nn.sigmoid(gates[:, 3 * H:4 * H])
            c[l] = f * c[l] + i * g
            h[l] = o * jnp.tanh(c[l])
            h_in = h[l]
        ys.append(jnp.tanh(jnp.dot(h_in, out_w.T, precision=prec) + out_b))
    return jnp.stack(ys), (jnp.stack(h), jnp.stack(c))


if __name__ == "__main__":
    input_size, output_size, hidden_size, n_layers = 20, 10, 32, 2
    batch_size, seq_len = 2, 8

    key = jax.random.PRNGKey(0)
    k_param, k_x = jax.random.split(key)

    torch_params = init_torch_params(k_param, input_size, output_size,
                                     hidden_size, n_layers)
    kparams = prepare_params(torch_params)
    hidden = init_hidden(n_layers, batch_size, hidden_size)

    xs = jax.random.normal(k_x, (seq_len, batch_size, input_size), jnp.float32)

    # Single step: exact analogue of one nn.Module.forward call.
    y1, hid1 = lstm_forward(xs[0], kparams, hidden, output_size)
    jax.block_until_ready(y1)

    # Full T-step rollout: one kernel launch with VMEM-resident (h, c), the
    # whole sequence iterated inside the kernel (TT timesteps per grid step).
    ys, hid = lstm_forward_seq(xs, kparams, hidden, output_size)
    jax.block_until_ready(ys)
    jax.block_until_ready(hid)

    assert y1.shape == (batch_size, output_size)
    assert ys.shape == (seq_len, batch_size, output_size)
    assert bool(jnp.all(jnp.isfinite(ys)))
    assert bool(jnp.all(jnp.abs(ys) <= 1.0))      # tanh output head

    # Verify against the f32 reference (kernel uses bf16 MXU operands).
    ys_ref, (h_ref_out, _) = lstm_reference(xs, torch_params,
                                            hidden_size, n_layers)
    tol = 5e-2
    assert float(jnp.max(jnp.abs(y1 - ys_ref[0]))) < tol
    assert float(jnp.max(jnp.abs(ys - ys_ref))) < tol
    h_valid = hid[0][:, :batch_size, :hidden_size]
    assert float(jnp.max(jnp.abs(h_valid - h_ref_out))) < tol

    print("KERNEL_OK")
</pallas_src>

<mosaic_0001>
module attributes {stable_mosaic.version = 11 : i64} {
  func.func @_lstm_seq_kernel(%arg0: i32, %arg1: memref<1x8x128xf32, #tpu.memory_space<vmem>>, %arg2: memref<2x128x512xbf16, #tpu.memory_space<vmem>>, %arg3: memref<2x128x512xbf16, #tpu.memory_space<vmem>>, %arg4: memref<2x1x512xf32, #tpu.memory_space<vmem>>, %arg5: memref<2x8x128xf32, #tpu.memory_space<vmem>>, %arg6: memref<2x8x128xf32, #tpu.memory_space<vmem>>, %arg7: memref<1x8x128xf32, #tpu.memory_space<vmem>>, %arg8: memref<2x8x128xf32, #tpu.memory_space<vmem>>, %arg9: memref<2x8x128xf32, #tpu.memory_space<vmem>>) attributes {dimension_semantics = [#tpu.dimension_semantics<arbitrary>], iteration_bounds = array<i64: 1>, scalar_prefetch = 0 : i64, scratch_operands = 0 : i64, tpu.core_type = #tpu.core_type<tc>, window_params = [{transform_indices = @transform_0, window_bounds = array<i64: 1, 8, 128>}, {pipeline_mode = #tpu.pipeline_mode<synchronous>, transform_indices = @transform_1, window_bounds = array<i64: 2, 128, 512>}, {pipeline_mode = #tpu.pipeline_mode<synchronous>, transform_indices = @transform_2, window_bounds = array<i64: 2, 128, 512>}, {pipeline_mode = #tpu.pipeline_mode<synchronous>, transform_indices = @transform_3, window_bounds = array<i64: 2, 1, 512>}, {pipeline_mode = #tpu.pipeline_mode<synchronous>, transform_indices = @transform_4, window_bounds = array<i64: 2, 8, 128>}, {pipeline_mode = #tpu.pipeline_mode<synchronous>, transform_indices = @transform_5, window_bounds = array<i64: 2, 8, 128>}, {transform_indices = @transform_6, window_bounds = array<i64: 1, 8, 128>}, {pipeline_mode = #tpu.pipeline_mode<synchronous>, transform_indices = @transform_7, window_bounds = array<i64: 2, 8, 128>}, {pipeline_mode = #tpu.pipeline_mode<synchronous>, transform_indices = @transform_8, window_bounds = array<i64: 2, 8, 128>}]} {
    %c0_i32 = arith.constant 0 : i32
    %0 = arith.cmpi eq, %arg0, %c0_i32 : i32
    %1 = arith.extui %0 : i1 to i32
    %c0_i32_0 = arith.constant 0 : i32
    %2 = arith.cmpi ne, %1, %c0_i32_0 : i32
    scf.if %2 {
      %c0_55 = arith.constant 0 : index
      %c0_56 = arith.constant 0 : index
      %c0_57 = arith.constant 0 : index
      %106 = vector.load %arg5[%c0_55, %c0_56, %c0_57] : memref<2x8x128xf32, #tpu.memory_space<vmem>>, vector<2x8x128xf32>
      %c0_58 = arith.constant 0 : index
      %c0_59 = arith.constant 0 : index
      %c0_60 = arith.constant 0 : index
      %107 = vector.load %arg8[%c0_58, %c0_59, %c0_60] : memref<2x8x128xf32, #tpu.memory_space<vmem>>, vector<2x8x128xf32>
      tpu.vector_store %arg8[%c0_58, %c0_59, %c0_60], %106 {strides = array<i32>} : memref<2x8x128xf32, #tpu.memory_space<vmem>>, vector<2x8x128xf32>,
      %c0_61 = arith.constant 0 : index
      %c0_62 = arith.constant 0 : index
      %c0_63 = arith.constant 0 : index
      %108 = vector.load %arg6[%c0_61, %c0_62, %c0_63] : memref<2x8x128xf32, #tpu.memory_space<vmem>>, vector<2x8x128xf32>
      %c0_64 = arith.constant 0 : index
      %c0_65 = arith.constant 0 : index
      %c0_66 = arith.constant 0 : index
      %109 = vector.load %arg9[%c0_64, %c0_65, %c0_66] : memref<2x8x128xf32, #tpu.memory_space<vmem>>, vector<2x8x128xf32>
      tpu.vector_store %arg9[%c0_64, %c0_65, %c0_66], %108 {strides = array<i32>} : memref<2x8x128xf32, #tpu.memory_space<vmem>>, vector<2x8x128xf32>,
    } else {
    }
    %c0_i32_1 = arith.constant 0 : i32
    %3 = arith.index_cast %c0_i32_1 : i32 to index
    %c0 = arith.constant 0 : index
    %c0_2 = arith.constant 0 : index
    %4 = vector.load %arg1[%3, %c0, %c0_2] : memref<1x8x128xf32, #tpu.memory_space<vmem>>, vector<1x8x128xf32>
    %5 = vector.shape_cast %4 : vector<1x8x128xf32> to vector<8x128xf32>
    %6 = arith.truncf %5 : vector<8x128xf32> to vector<8x128xbf16>
    %c0_3 = arith.constant 0 : index
    %c0_4 = arith.constant 0 : index
    %c0_5 = arith.constant 0 : index
    %7 = vector.load %arg8[%c0_3, %c0_4, %c0_5] : memref<2x8x128xf32, #tpu.memory_space<vmem>>, vector<1x8x128xf32>
    %8 = vector.shape_cast %7 : vector<1x8x128xf32> to vector<8x128xf32>
    %c0_6 = arith.constant 0 : index
    %c0_7 = arith.constant 0 : index
    %c0_8 = arith.constant 0 : index
    %9 = vector.load %arg9[%c0_6, %c0_7, %c0_8] : memref<2x8x128xf32, #tpu.memory_space<vmem>>, vector<1x8x128xf32>
    %10 = vector.shape_cast %9 : vector<1x8x128xf32> to vector<8x128xf32>
    %c0_9 = arith.constant 0 : index
    %c0_10 = arith.constant 0 : index
    %c0_11 = arith.constant 0 : index
    %11 = vector.load %arg2[%c0_9, %c0_10, %c0_11] : memref<2x128x512xbf16, #tpu.memory_space<vmem>>, vector<1x128x512xbf16>
    %12 = vector.shape_cast %11 : vector<1x128x512xbf16> to vector<128x512xbf16>
    %cst = arith.constant dense<0.000000e+00> : vector<8x512xf32>
    %13 = tpu.matmul %6, %12, %cst {dimension_numbers = #tpu.dot_dimension_numbers<[1], [0], [0], [1], [0, 0, 1, 1], [], []>} : vector<8x128xbf16>, vector<128x512xbf16>, vector<8x512xf32> -> vector<8x512xf32>
    %14 = arith.truncf %8 : vector<8x128xf32> to vector<8x128xbf16>
    %c0_12 = arith.constant 0 : index
    %c0_13 = arith.constant 0 : index
    %c0_14 = arith.constant 0 : index
    %15 = vector.load %arg3[%c0_12, %c0_13, %c0_14] : memref<2x128x512xbf16, #tpu.memory_space<vmem>>, vector<1x128x512xbf16>
    %16 = vector.shape_cast %15 : vector<1x128x512xbf16> to vector<128x512xbf16>
    %cst_15 = arith.constant dense<0.000000e+00> : vector<8x512xf32>
    %17 = tpu.matmul %14, %16, %cst_15 {dimension_numbers = #tpu.dot_dimension_numbers<[1], [0], [0], [1], [0, 0, 1, 1], [], []>} : vector<8x128xbf16>, vector<128x512xbf16>, vector<8x512xf32> -> vector<8x512xf32>
    %18 = arith.addf %13, %17 : vector<8x512xf32>
    %c0_16 = arith.constant 0 : index
    %c0_17 = arith.constant 0 : index
    %c0_18 = arith.constant 0 : index
    %19 = vector.load %arg4[%c0_16, %c0_17, %c0_18] : memref<2x1x512xf32, #tpu.memory_space<vmem>>, vector<1x1x512xf32>
    %20 = vector.shape_cast %19 : vector<1x1x512xf32> to vector<1x512xf32>
    %21 = vector.broadcast %20 : vector<1x512xf32> to vector<8x512xf32>
    %22 = arith.addf %18, %21 : vector<8x512xf32>
    %23 = vector.extract_strided_slice %22 {offsets = [0, 0], sizes = [8, 128], strides = [1, 1]} : vector<8x512xf32> to vector<8x128xf32>
    %24 = arith.negf %23 : vector<8x128xf32>
    %25 = math.exp %24 : vector<8x128xf32>
    %cst_19 = arith.constant 1.000000e+00 : f32
    %26 = vector.broadcast %cst_19 : f32 to vector<8x128xf32>
    %27 = arith.addf %26, %25 : vector<8x128xf32>
    %28 = arith.divf %26, %27 : vector<8x128xf32>
    %29 = vector.extract_strided_slice %22 {offsets = [0, 128], sizes = [8, 128], strides = [1, 1]} : vector<8x512xf32> to vector<8x128xf32>
    %30 = arith.negf %29 : vector<8x128xf32>
    %31 = math.exp %30 : vector<8x128xf32>
    %cst_20 = arith.constant 1.000000e+00 : f32
    %32 = vector.broadcast %cst_20 : f32 to vector<8x128xf32>
    %33 = arith.addf %32, %31 : vector<8x128xf32>
    %34 = arith.divf %32, %33 : vector<8x128xf32>
    %35 = vector.extract_strided_slice %22 {offsets = [0, 256], sizes = [8, 128], strides = [1, 1]} : vector<8x512xf32> to vector<8x128xf32>
    %36 = math.tanh %35 : vector<8x128xf32>
    %37 = vector.extract_strided_slice %22 {offsets = [0, 384], sizes = [8, 128], strides = [1, 1]} : vector<8x512xf32> to vector<8x128xf32>
    %38 = arith.negf %37 : vector<8x128xf32>
    %39 = math.exp %38 : vector<8x128xf32>
    %cst_21 = arith.constant 1.000000e+00 : f32
    %40 = vector.broadcast %cst_21 : f32 to vector<8x128xf32>
    %41 = arith.addf %40, %39 : vector<8x128xf32>
    %42 = arith.divf %40, %41 : vector<8x128xf32>
    %43 = arith.mulf %34, %10 : vector<8x128xf32>
    %44 = arith.mulf %28, %36 : vector<8x128xf32>
    %45 = arith.addf %43, %44 : vector<8x128xf32>
    %46 = math.tanh %45 : vector<8x128xf32>
    %47 = arith.mulf %42, %46 : vector<8x128xf32>
    %c0_22 = arith.constant 0 : index
    %c0_23 = arith.constant 0 : index
    %c0_24 = arith.constant 0 : index
    %48 = vector.load %arg8[%c0_22, %c0_23, %c0_24] : memref<2x8x128xf32, #tpu.memory_space<vmem>>, vector<1x8x128xf32>
    %49 = vector.shape_cast %48 : vector<1x8x128xf32> to vector<8x128xf32>
    %50 = vector.shape_cast %47 : vector<8x128xf32> to vector<1x8x128xf32>
    tpu.vector_store %arg8[%c0_22, %c0_23, %c0_24], %50 {strides = array<i32>} : memref<2x8x128xf32, #tpu.memory_space<vmem>>, vector<1x8x128xf32>,
    %c0_25 = arith.constant 0 : index
    %c0_26 = arith.constant 0 : index
    %c0_27 = arith.constant 0 : index
    %51 = vector.load %arg9[%c0_25, %c0_26, %c0_27] : memref<2x8x128xf32, #tpu.memory_space<vmem>>, vector<1x8x128xf32>
    %52 = vector.shape_cast %51 : vector<1x8x128xf32> to vector<8x128xf32>
    %53 = vector.shape_cast %45 : vector<8x128xf32> to vector<1x8x128xf32>
    tpu.vector_store %arg9[%c0_25, %c0_26, %c0_27], %53 {strides = array<i32>} : memref<2x8x128xf32, #tpu.memory_space<vmem>>, vector<1x8x128xf32>,
    %54 = arith.truncf %47 : vector<8x128xf32> to vector<8x128xbf16>
    %c1 = arith.constant 1 : index
    %c0_28 = arith.constant 0 : index
    %c0_29 = arith.constant 0 : index
    %55 = vector.load %arg8[%c1, %c0_28, %c0_29] : memref<2x8x128xf32, #tpu.memory_space<vmem>>, vector<1x8x128xf32>
    %56 = vector.shape_cast %55 : vector<1x8x128xf32> to vector<8x128xf32>
    %c1_30 = arith.constant 1 : index
    %c0_31 = arith.constant 0 : index
    %c0_32 = arith.constant 0 : index
    %57 = vector.load %arg9[%c1_30, %c0_31, %c0_32] : memref<2x8x128xf32, #tpu.memory_space<vmem>>, vector<1x8x128xf32>
    %58 = vector.shape_cast %57 : vector<1x8x128xf32> to vector<8x128xf32>
    %c1_33 = arith.constant 1 : index
    %c0_34 = arith.constant 0 : index
    %c0_35 = arith.constant 0 : index
    %59 = vector.load %arg2[%c1_33, %c0_34, %c0_35] : memref<2x128x512xbf16, #tpu.memory_space<vmem>>, vector<1x128x512xbf16>
    %60 = vector.shape_cast %59 : vector<1x128x512xbf16> to vector<128x512xbf16>
    %cst_36 = arith.constant dense<0.000000e+00> : vector<8x512xf32>
    %61 = tpu.matmul %54, %60, %cst_36 {dimension_numbers = #tpu.dot_dimension_numbers<[1], [0], [0], [1], [0, 0, 1, 1], [], []>} : vector<8x128xbf16>, vector<128x512xbf16>, vector<8x512xf32> -> vector<8x512xf32>
    %62 = arith.truncf %56 : vector<8x128xf32> to vector<8x128xbf16>
    %c1_37 = arith.constant 1 : index
    %c0_38 = arith.constant 0 : index
    %c0_39 = arith.constant 0 : index
    %63 = vector.load %arg3[%c1_37, %c0_38, %c0_39] : memref<2x128x512xbf16, #tpu.memory_space<vmem>>, vector<1x128x512xbf16>
    %64 = vector.shape_cast %63 : vector<1x128x512xbf16> to vector<128x512xbf16>
    %cst_40 = arith.constant dense<0.000000e+00> : vector<8x512xf32>
    %65 = tpu.matmul %62, %64, %cst_40 {dimension_numbers = #tpu.dot_dimension_numbers<[1], [0], [0], [1], [0, 0, 1, 1], [], []>} : vector<8x128xbf16>, vector<128x512xbf16>, vector<8x512xf32> -> vector<8x512xf32>
    %66 = arith.addf %61, %65 : vector<8x512xf32>
    %c1_41 = arith.constant 1 : index
    %c0_42 = arith.constant 0 : index
    %c0_43 = arith.constant 0 : index
    %67 = vector.load %arg4[%c1_41, %c0_42, %c0_43] : memref<2x1x512xf32, #tpu.memory_space<vmem>>, vector<1x1x512xf32>
    %68 = vector.shape_cast %67 : vector<1x1x512xf32> to vector<1x512xf32>
    %69 = vector.broadcast %68 : vector<1x512xf32> to vector<8x512xf32>
    %70 = arith.addf %66, %69 : vector<8x512xf32>
    %71 = vector.extract_strided_slice %70 {offsets = [0, 0], sizes = [8, 128], strides = [1, 1]} : vector<8x512xf32> to vector<8x128xf32>
    %72 = arith.negf %71 : vector<8x128xf32>
    %73 = math.exp %72 : vector<8x128xf32>
    %cst_44 = arith.constant 1.000000e+00 : f32
    %74 = vector.broadcast %cst_44 : f32 to vector<8x128xf32>
    %75 = arith.addf %74, %73 : vector<8x128xf32>
    %76 = arith.divf %74, %75 : vector<8x128xf32>
    %77 = vector.extract_strided_slice %70 {offsets = [0, 128], sizes = [8, 128], strides = [1, 1]} : vector<8x512xf32> to vector<8x128xf32>
    %78 = arith.negf %77 : vector<8x128xf32>
    %79 = math.exp %78 : vector<8x128xf32>
    %cst_45 = arith.constant 1.000000e+00 : f32
    %80 = vector.broadcast %cst_45 : f32 to vector<8x128xf32>
    %81 = arith.addf %80, %79 : vector<8x128xf32>
    %82 = arith.divf %80, %81 : vector<8x128xf32>
    %83 = vector.extract_strided_slice %70 {offsets = [0, 256], sizes = [8, 128], strides = [1, 1]} : vector<8x512xf32> to vector<8x128xf32>
    %84 = math.tanh %83 : vector<8x128xf32>
    %85 = vector.extract_strided_slice %70 {offsets = [0, 384], sizes = [8, 128], strides = [1, 1]} : vector<8x512xf32> to vector<8x128xf32>
    %86 = arith.negf %85 : vector<8x128xf32>
    %87 = math.exp %86 : vector<8x128xf32>
    %cst_46 = arith.constant 1.000000e+00 : f32
    %88 = vector.broadcast %cst_46 : f32 to vector<8x128xf32>
    %89 = arith.addf %88, %87 : vector<8x128xf32>
    %90 = arith.divf %88, %89 : vector<8x128xf32>
    %91 = arith.mulf %82, %58 : vector<8x128xf32>
    %92 = arith.mulf %76, %84 : vector<8x128xf32>
    %93 = arith.addf %91, %92 : vector<8x128xf32>
    %94 = math.tanh %93 : vector<8x128xf32>
    %95 = arith.mulf %90, %94 : vector<8x128xf32>
    %c1_47 = arith.constant 1 : index
    %c0_48 = arith.constant 0 : index
    %c0_49 = arith.constant 0 : index
    %96 = vector.load %arg8[%c1_47, %c0_48, %c0_49] : memref<2x8x128xf32, #tpu.memory_space<vmem>>, vector<1x8x128xf32>
    %97 = vector.shape_cast %96 : vector<1x8x128xf32> to vector<8x128xf32>
    %98 = vector.shape_cast %95 : vector<8x128xf32> to vector<1x8x128xf32>
    tpu.vector_store %arg8[%c1_47, %c0_48, %c0_49], %98 {strides = array<i32>} : memref<2x8x128xf32, #tpu.memory_space<vmem>>, vector<1x8x128xf32>,
    %c1_50 = arith.constant 1 : index
    %c0_51 = arith.constant 0 : index
    %c0_52 = arith.constant 0 : index
    %99 = vector.load %arg9[%c1_50, %c0_51, %c0_52] : memref<2x8x128xf32, #tpu.memory_space<vmem>>, vector<1x8x128xf32>
    %100 = vector.shape_cast %99 : vector<1x8x128xf32> to vector<8x128xf32>
    %101 = vector.shape_cast %93 : vector<8x128xf32> to vector<1x8x128xf32>
    tpu.vector_store %arg9[%c1_50, %c0_51, %c0_52], %101 {strides = array<i32>} : memref<2x8x128xf32, #tpu.memory_space<vmem>>, vector<1x8x128xf32>,
    %102 = arith.index_cast %c0_i32_1 : i32 to index
    %c0_53 = arith.constant 0 : index
    %c0_54 = arith.constant 0 : index
    %103 = vector.load %arg7[%102, %c0_53, %c0_54] : memref<1x8x128xf32, #tpu.memory_space<vmem>>, vector<1x8x128xf32>
    %104 = vector.shape_cast %103 : vector<1x8x128xf32> to vector<8x128xf32>
    %105 = vector.shape_cast %95 : vector<8x128xf32> to vector<1x8x128xf32>
    tpu.vector_store %arg7[%102, %c0_53, %c0_54], %105 {strides = array<i32>} : memref<1x8x128xf32, #tpu.memory_space<vmem>>, vector<1x8x128xf32>,
    %c1_i32 = arith.constant 1 : i32
    return
  }
  func.func @transform_0(%arg0: i32) -> (i32, i32, i32) {
    %c0_i32 = arith.constant 0 : i32
    %c0_i32_0 = arith.constant 0 : i32
    %c0_i32_1 = arith.constant 0 : i32
    return %arg0, %c0_i32, %c0_i32_0 : i32, i32, i32
  }
  func.func @transform_1(%arg0: i32) -> (i32, i32, i32) {
    %c0_i32 = arith.constant 0 : i32
    %c0_i32_0 = arith.constant 0 : i32
    %c0_i32_1 = arith.constant 0 : i32
    %c0_i32_2 = arith.constant 0 : i32
    return %c0_i32, %c0_i32_0, %c0_i32_1 : i32, i32, i32
  }
  func.func @transform_2(%arg0: i32) -> (i32, i32, i32) {
    %c0_i32 = arith.constant 0 : i32
    %c0_i32_0 = arith.constant 0 : i32
    %c0_i32_1 = arith.constant 0 : i32
    %c0_i32_2 = arith.constant 0 : i32
    return %c0_i32, %c0_i32_0, %c0_i32_1 : i32, i32, i32
  }
  func.func @transform_3(%arg0: i32) -> (i32, i32, i32) {
    %c0_i32 = arith.constant 0 : i32
    %c0_i32_0 = arith.constant 0 : i32
    %c0_i32_1 = arith.constant 0 : i32
    %c0_i32_2 = arith.constant 0 : i32
    return %c0_i32, %c0_i32_0, %c0_i32_1 : i32, i32, i32
  }
  func.func @transform_4(%arg0: i32) -> (i32, i32, i32) {
    %c0_i32 = arith.constant 0 : i32
    %c0_i32_0 = arith.constant 0 : i32
    %c0_i32_1 = arith.constant 0 : i32
    %c0_i32_2 = arith.constant 0 : i32
    return %c0_i32, %c0_i32_0, %c0_i32_1 : i32, i32, i32
  }
  func.func @transform_5(%arg0: i32) -> (i32, i32, i32) {
    %c0_i32 = arith.constant 0 : i32
    %c0_i32_0 = arith.constant 0 : i32
    %c0_i32_1 = arith.constant 0 : i32
    %c0_i32_2 = arith.constant 0 : i32
    return %c0_i32, %c0_i32_0, %c0_i32_1 : i32, i32, i32
  }
  func.func @transform_6(%arg0: i32) -> (i32, i32, i32) {
    %c0_i32 = arith.constant 0 : i32
    %c0_i32_0 = arith.constant 0 : i32
    %c0_i32_1 = arith.constant 0 : i32
    return %arg0, %c0_i32, %c0_i32_0 : i32, i32, i32
  }
  func.func @transform_7(%arg0: i32) -> (i32, i32, i32) {
    %c0_i32 = arith.constant 0 : i32
    %c0_i32_0 = arith.constant 0 : i32
    %c0_i32_1 = arith.constant 0 : i32
    %c0_i32_2 = arith.constant 0 : i32
    return %c0_i32, %c0_i32_0, %c0_i32_1 : i32, i32, i32
  }
  func.func @transform_8(%arg0: i32) -> (i32, i32, i32) {
    %c0_i32 = arith.constant 0 : i32
    %c0_i32_0 = arith.constant 0 : i32
    %c0_i32_1 = arith.constant 0 : i32
    %c0_i32_2 = arith.constant 0 : i32
    return %c0_i32, %c0_i32_0, %c0_i32_1 : i32, i32, i32
  }
}

</mosaic_0001>

<bundles_post_ra>
// kernel: tpu_custom_call.1
= control target key start
LH: loop header
LB: loop body
LE: loop exit
PB: predicated region body
PF: predicated region fallthrough
CT: control target
= control target key end

     0   :  { %14 = vsyncpa [#allocation3], 0  ;;  %s2107_s0 = inlined_call_operand.vmem [shape: f32[1,8,128], index: 0, kind: input, shape index: {}]   ;;  %s2108_s1 = inlined_call_operand.hbm [shape: bf16[2,128,512], index: 1, kind: input, shape index: {}]   ;;  %s2109_s2 = inlined_call_operand.hbm [shape: bf16[2,128,512], index: 2, kind: input, shape index: {}]   ;;  %s2110_s3 = inlined_call_operand.vmem [shape: f32[2,1,512], index: 3, kind: input, shape index: {}]   ;;  %s2111_s4 = inlined_call_operand.hbm [shape: f32[2,8,128], index: 4, kind: input, shape index: {}, may-alias: {4,7}]   ;;  %s2112_s5 = inlined_call_operand.hbm [shape: f32[2,8,128], index: 5, kind: input, shape index: {}, may-alias: {5,8}]   ;;  %s2113_s6 = inlined_call_operand.hbm [shape: f32[1,8,128], index: 6, kind: output, shape index: {0}]   ;;  %s2114_s7 = inlined_call_operand.hbm [shape: f32[2,8,128], index: 7, kind: output, shape index: {1}, may-alias: {4,7}]   ;;  %s2115_s8 = inlined_call_operand.hbm [shape: f32[2,8,128], index: 8, kind: output, shape index: {2}, may-alias: {5,8}]  }
   0x1   :  { %15 = vsyncpa [#allocation6], 0 }
   0x2   :  { %16 = vsyncpa [#allocation9], 0 }
   0x3   :  { %17 = vsyncpa [#allocation4], 0 }
   0x4   :  { %18 = vsyncpa [#allocation12], 0  ;;  %s1894_s27 = smov [#allocation5]   ;;  %s1895_s29 = smov [#allocation2]  }
   0x5   :  { %s38_s28 = sshll.u32 %s1894_s27, 4  ;;  %s26_s30 = sshll.u32 %s1895_s29, 4  ;;  %s39_s28 = int_to_ptr.vmem [resolvable:$true] %s38_s28  ;;  %s1951_s30 = int_to_ptr.vmem [resolvable:$true] %s26_s30 }
   0x6   :  { %s1730_s11 = scalar_lea.hbm %s2109_s2, 8192 }
   0x7   :  { %p1731_p0 = scmp.ne.s32.totalorder %s2109_s2, %s1730_s11  ;;  %p1734_p1 = scmp.lt.u32.totalorder %s1730_s11, %s2109_s2 }
   0x9   :  { %p1736_p2 = pnand %p1734_p1, %p1731_p0 }
   0xb   :  { %1739 = shalt.err (!%p1736_p2)
}
   0xc   :  { %s1740_s16 = scalar_lea.vmem %s39_s28, 8192  ;;  %p1745_p4 = scmp.lt.s32.totalorder %s39_s28, %s39_s28 }
   0xd   :  { %p1741_p3 = scmp.ne.s32.totalorder %s39_s28, %s1740_s16  ;;  %p1746_p5 = scmp.lt.s32.totalorder %s1740_s16, %s1740_s16 }
   0xf   :  { %p1747_p6 = por %p1746_p5, %p1745_p4 }
  0x11   :  { %p1748_p7 = pnand %p1747_p6, %p1741_p3 }
  0x13   :  { %1751 = shalt.err (!%p1748_p7)
}
  0x14   :  { %s1896_s17 = smov 256   ;;  %s1897_s18 = smov 16  }
  0x15   :  { %44 = dma.hbm_to_vmem [thread:$0]  %s2109_s2, 8192, %s39_s28, [#allocation6], %s1896_s17, %s1896_s17, %s1897_s18  }
  0x16   :  { %s1752_s23 = scalar_lea.hbm %s2108_s1, 8192 }
  0x17   :  { %p1753_p8 = scmp.ne.s32.totalorder %s2108_s1, %s1752_s23  ;;  %p1756_p9 = scmp.lt.u32.totalorder %s1752_s23, %s2108_s1 }
  0x19   :  { %p1758_p10 = pnand %p1756_p9, %p1753_p8 }
  0x1b   :  { %1761 = shalt.err (!%p1758_p10)
}
  0x1c   :  { %s1762_s29 = scalar_lea.vmem %s1951_s30, 8192  ;;  %p1767_p12 = scmp.lt.s32.totalorder %s1951_s30, %s1951_s30 }
  0x1d   :  { %p1763_p11 = scmp.ne.s32.totalorder %s1951_s30, %s1762_s29  ;;  %p1768_p13 = scmp.lt.s32.totalorder %s1762_s29, %s1762_s29 }
  0x1f   :  { %p1769_p0 = por %p1768_p13, %p1767_p12 }
  0x21   :  { %p1770_p1 = pnand %p1769_p0, %p1763_p11 }
  0x23   :  { %1773 = shalt.err (!%p1770_p1)
}
  0x24   :  { %32 = dma.hbm_to_vmem [thread:$0]  %s2108_s1, 8192, %s1951_s30, [#allocation3], %s1896_s17, %s1896_s17, %s1897_s18  }
  0x25   :  { %s1898_s9 = smov [#allocation7]   ;;  %s1774_s13 = scalar_lea.hbm %s2111_s4, 256 }
  0x26   :  { %s52_s10 = sshll.u32 %s1898_s9, 4  ;;  %p1775_p2 = scmp.ne.s32.totalorder %s2111_s4, %s1774_s13  ;;  %s53_s10 = int_to_ptr.vmem [resolvable:$true] %s52_s10 }
  0x27   :  { %p1778_p3 = scmp.lt.u32.totalorder %s1774_s13, %s2111_s4 }
  0x29   :  { %p1780_p4 = pnand %p1778_p3, %p1775_p2 }
  0x2b   :  { %1783 = shalt.err (!%p1780_p4)
}
  0x2c   :  { %s1784_s20 = scalar_lea.vmem %s53_s10, 256  ;;  %p1789_p6 = scmp.lt.s32.totalorder %s53_s10, %s53_s10 }
  0x2d   :  { %p1785_p5 = scmp.ne.s32.totalorder %s53_s10, %s1784_s20  ;;  %p1790_p7 = scmp.lt.s32.totalorder %s1784_s20, %s1784_s20 }
  0x2f   :  { %p1791_p8 = por %p1790_p7, %p1789_p6 }
  0x31   :  { %p1792_p9 = pnand %p1791_p8, %p1785_p5 }
  0x33   :  { %1795 = shalt.err (!%p1792_p9)
}
  0x34   :  { %s1899_s1 = smov 128   ;;  %s1900_s30 = smov 8  }
  0x35   :  { %58 = dma.hbm_to_vmem [thread:$0]  %s2111_s4, 256, %s53_s10, [#allocation6], %s1899_s1, %s1899_s1, %s1900_s30  }
  0x36   :  { %s1901_s21 = smov [#allocation8]   ;;  %s1796_s25 = scalar_lea.hbm %s2112_s5, 256 }
  0x37   :  { %s64_s22 = sshll.u32 %s1901_s21, 4  ;;  %p1797_p10 = scmp.ne.s32.totalorder %s2112_s5, %s1796_s25  ;;  %s65_s22 = int_to_ptr.vmem [resolvable:$true] %s64_s22 }
  0x38   :  { %p1800_p11 = scmp.lt.u32.totalorder %s1796_s25, %s2112_s5 }
  0x3a   :  { %p1802_p12 = pnand %p1800_p11, %p1797_p10 }
  0x3c   :  { %1805 = shalt.err (!%p1802_p12)
}
  0x3d   :  { %s1806_s28 = scalar_lea.vmem %s65_s22, 256  ;;  %p1811_p0 = scmp.lt.s32.totalorder %s65_s22, %s65_s22 }
  0x3e   :  { %p1807_p13 = scmp.ne.s32.totalorder %s65_s22, %s1806_s28  ;;  %p1812_p1 = scmp.lt.s32.totalorder %s1806_s28, %s1806_s28 }
  0x40   :  { %p1813_p2 = por %p1812_p1, %p1811_p0 }
  0x42   :  { %p1814_p3 = pnand %p1813_p2, %p1807_p13 }
  0x44   :  { %1817 = shalt.err (!%p1814_p3)
}
  0x45   :  { %70 = dma.hbm_to_vmem [thread:$0]  %s2112_s5, 256, %s65_s22, [#allocation9], %s1899_s1, %s1899_s1, %s1900_s30  }
  0x46   :  { %1884 = dma.done.wait [#allocation3], 8192  }
  0x47   :  { %1885 = vsyncadd [#allocation3], 4294959104 }
  0x48   :  { %1886 = dma.done.wait [#allocation6], 8448  }
  0x49   :  { %1887 = vsyncadd [#allocation6], 4294958848 }
  0x4a   :  { %1888 = dma.done.wait [#allocation9], 256  }
  0x4b   :  { %1889 = vsyncadd [#allocation9], 4294967040  ;;  %v1902_v0 = vmov 0   ;;  %v1506_v1 = vld [vmem:[#allocation5 + $0x4] ss:$16 sps:$4 sm:$0xff]   ;;  %s1904_s15 = smov [#allocation10]  }
  0x4c   :  { %357 = vmatprep.mubr.bf16.mxu0 %v1902_v0  ;;  %398 = vmatprep.mubr.bf16.mxu1 %v1902_v0  ;;  %v1508_v2 = vld [vmem:[#allocation5 + $0xc] ss:$16 sps:$4 sm:$0xff]   ;;  %v1510_v3 = vld [vmem:[#allocation5] ss:$16 sps:$4 sm:$0xff]   ;;  %v1511_v4 = vld [vmem:[#allocation5 + $0x8] ss:$16 sps:$4 sm:$0xff]  }
  0x4d   :  { %325 = vmatprep.subr.bf16.mxu0 %v1506_v1  ;;  %366 = vmatprep.subr.bf16.mxu1 %v1508_v2  ;;  %v1512_v5 = vld [vmem:[#allocation5 + $0x24] ss:$16 sps:$4 sm:$0xff]   ;;  %v1514_v6 = vld [vmem:[#allocation5 + $0x2c] ss:$16 sps:$4 sm:$0xff]   ;;  %v1516_v7 = vld [vmem:[#allocation5 + $0x20] ss:$16 sps:$4 sm:$0xff]  }
  0x4e   :  { %326 = vmatpush1.bf16.msra.mxu0 %v1510_v3  ;;  %367 = vmatpush1.bf16.msra.mxu1 %v1511_v4  ;;  %v1517_v8 = vld [vmem:[#allocation5 + $0x28] ss:$16 sps:$4 sm:$0xff]   ;;  %v1518_v9 = vld [vmem:[#allocation5 + $0x44] ss:$16 sps:$4 sm:$0xff]   ;;  %v1520_v10 = vld [vmem:[#allocation5 + $0x4c] ss:$16 sps:$4 sm:$0xff]  }
  0x4f   :  { %327 = vmatprep.subr.bf16.mxu0 %v1512_v5  ;;  %368 = vmatprep.subr.bf16.mxu1 %v1514_v6  ;;  %v1522_v11 = vld [vmem:[#allocation5 + $0x40] ss:$16 sps:$4 sm:$0xff]   ;;  %v1523_v12 = vld [vmem:[#allocation5 + $0x48] ss:$16 sps:$4 sm:$0xff]   ;;  %v1524_v13 = vld [vmem:[#allocation5 + $0x64] ss:$16 sps:$4 sm:$0xff]  }
  0x50   :  { %v1526_v14 = vld [vmem:[#allocation5 + $0x6c] ss:$16 sps:$4 sm:$0xff]   ;;  %v1528_v15 = vld [vmem:[#allocation5 + $0x60] ss:$16 sps:$4 sm:$0xff]   ;;  %v1529_v16 = vld [vmem:[#allocation5 + $0x68] ss:$16 sps:$4 sm:$0xff]  }
  0x51   :  { %v1530_v17 = vld [vmem:[#allocation5 + $0x84] ss:$16 sps:$4 sm:$0xff]   ;;  %v1532_v18 = vld [vmem:[#allocation5 + $0x8c] ss:$16 sps:$4 sm:$0xff]   ;;  %v1534_v19 = vld [vmem:[#allocation5 + $0x80] ss:$16 sps:$4 sm:$0xff]  }
  0x52   :  { %328 = vmatpush1.bf16.msra.mxu0 %v1516_v7  ;;  %369 = vmatpush1.bf16.msra.mxu1 %v1517_v8  ;;  %v1535_v20 = vld [vmem:[#allocation5 + $0x88] ss:$16 sps:$4 sm:$0xff]   ;;  %v1536_v21 = vld [vmem:[#allocation5 + $0xa4] ss:$16 sps:$4 sm:$0xff]   ;;  %v1538_v22 = vld [vmem:[#allocation5 + $0xac] ss:$16 sps:$4 sm:$0xff]  }
  0x53   :  { %329 = vmatprep.subr.bf16.mxu0 %v1518_v9  ;;  %370 = vmatprep.subr.bf16.mxu1 %v1520_v10  ;;  %v1540_v23 = vld [vmem:[#allocation5 + $0xa0] ss:$16 sps:$4 sm:$0xff]   ;;  %v1541_v24 = vld [vmem:[#allocation5 + $0xa8] ss:$16 sps:$4 sm:$0xff]   ;;  %v1542_v25 = vld [vmem:[#allocation5 + $0xc4] ss:$16 sps:$4 sm:$0xff]  }
  0x54   :  { %v1544_v26 = vld [vmem:[#allocation5 + $0xcc] ss:$16 sps:$4 sm:$0xff]   ;;  %v1546_v27 = vld [vmem:[#allocation5 + $0xc0] ss:$16 sps:$4 sm:$0xff]   ;;  %v1547_v28 = vld [vmem:[#allocation5 + $0xc8] ss:$16 sps:$4 sm:$0xff]  }
  0x55   :  { %v1548_v29 = vld [vmem:[#allocation5 + $0xe4] ss:$16 sps:$4 sm:$0xff]   ;;  %v1550_v30 = vld [vmem:[#allocation5 + $0xec] ss:$16 sps:$4 sm:$0xff]   ;;  %v1552_v31 = vld [vmem:[#allocation5 + $0xe0] ss:$16 sps:$4 sm:$0xff]  }
  0x56   :  { %330 = vmatpush1.bf16.msra.mxu0 %v1522_v11  ;;  %371 = vmatpush1.bf16.msra.mxu1 %v1523_v12  ;;  %v1553_v32 = vld [vmem:[#allocation5 + $0xe8] ss:$16 sps:$4 sm:$0xff]   ;;  %v88_v33 = vld [vmem:[#allocation7] sm:$0xff]  ;;  %v1559_v35 = vld [vmem:[#allocation2 + $0xc] ss:$16 sps:$4 sm:$0xff]   ;;  %s1317_s16 = sshll.u32 %s1904_s15, 4  ;;  %s2051_s16 = int_to_ptr.vmem [resolvable:$true] %s1317_s16 }
  0x57   :  { %331 = vmatprep.subr.bf16.mxu0 %v1524_v13  ;;  %372 = vmatprep.subr.bf16.mxu1 %v1526_v14  ;;  %v1556_v34 = vld [vmem:[#allocation2 + $0x4] ss:$16 sps:$4 sm:$0xff]   ;;  %v132_v36 = vpack.c.bf16 %v88_v33, %v88_v33  ;;  %v1554_v37 = vld [vmem:[#allocation2] ss:$16 sps:$4 sm:$0xff]   ;;  %v1557_v38 = vld [vmem:[#allocation2 + $0x8] ss:$16 sps:$4 sm:$0xff]  }
  0x58   :  { %v1562_v39 = vld [vmem:[#allocation2 + $0x24] ss:$16 sps:$4 sm:$0xff]   ;;  %v1565_v40 = vld [vmem:[#allocation2 + $0x2c] ss:$16 sps:$4 sm:$0xff]   ;;  %v1560_v41 = vld [vmem:[#allocation2 + $0x20] ss:$16 sps:$4 sm:$0xff]  }
  0x59   :  { %v1563_v42 = vld [vmem:[#allocation2 + $0x28] ss:$16 sps:$4 sm:$0xff]   ;;  %v1568_v43 = vld [vmem:[#allocation2 + $0x44] ss:$16 sps:$4 sm:$0xff]   ;;  %v1571_v44 = vld [vmem:[#allocation2 + $0x4c] ss:$16 sps:$4 sm:$0xff]  }
  0x5a   :  { %332 = vmatpush1.bf16.msra.mxu0 %v1528_v15  ;;  %373 = vmatpush1.bf16.msra.mxu1 %v1529_v16  ;;  %v1566_v45 = vld [vmem:[#allocation2 + $0x40] ss:$16 sps:$4 sm:$0xff]   ;;  %v1569_v46 = vld [vmem:[#allocation2 + $0x48] ss:$16 sps:$4 sm:$0xff]   ;;  %v1574_v47 = vld [vmem:[#allocation2 + $0x64] ss:$16 sps:$4 sm:$0xff]  }
  0x5b   :  { %333 = vmatprep.subr.bf16.mxu0 %v1530_v17  ;;  %374 = vmatprep.subr.bf16.mxu1 %v1532_v18  ;;  %v1577_v48 = vld [vmem:[#allocation2 + $0x6c] ss:$16 sps:$4 sm:$0xff]   ;;  %v1572_v49 = vld [vmem:[#allocation2 + $0x60] ss:$16 sps:$4 sm:$0xff]   ;;  %v1575_v50 = vld [vmem:[#allocation2 + $0x68] ss:$16 sps:$4 sm:$0xff]  }
  0x5c   :  { %v1580_v51 = vld [vmem:[#allocation2 + $0x84] ss:$16 sps:$4 sm:$0xff]   ;;  %v1583_v52 = vld [vmem:[#allocation2 + $0x8c] ss:$16 sps:$4 sm:$0xff]   ;;  %v1578_v53 = vld [vmem:[#allocation2 + $0x80] ss:$16 sps:$4 sm:$0xff]  }
  0x5d   :  { %v1581_v54 = vld [vmem:[#allocation2 + $0x88] ss:$16 sps:$4 sm:$0xff]   ;;  %v1586_v55 = vld [vmem:[#allocation2 + $0xa4] ss:$16 sps:$4 sm:$0xff]   ;;  %v1589_v56 = vld [vmem:[#allocation2 + $0xac] ss:$16 sps:$4 sm:$0xff]  }
  0x5e   :  { %334 = vmatpush1.bf16.msra.mxu0 %v1534_v19  ;;  %375 = vmatpush1.bf16.msra.mxu1 %v1535_v20  ;;  %v1584_v57 = vld [vmem:[#allocation2 + $0xa0] ss:$16 sps:$4 sm:$0xff]   ;;  %v1587_v58 = vld [vmem:[#allocation2 + $0xa8] ss:$16 sps:$4 sm:$0xff]   ;;  %v1592_v59 = vld [vmem:[#allocation2 + $0xc4] ss:$16 sps:$4 sm:$0xff]  }
  0x5f   :  { %335 = vmatprep.subr.bf16.mxu0 %v1536_v21  ;;  %376 = vmatprep.subr.bf16.mxu1 %v1538_v22  ;;  %v1595_v60 = vld [vmem:[#allocation2 + $0xcc] ss:$16 sps:$4 sm:$0xff]   ;;  %v1590_v61 = vld [vmem:[#allocation2 + $0xc0] ss:$16 sps:$4 sm:$0xff]   ;;  %v1593_v62 = vld [vmem:[#allocation2 + $0xc8] ss:$16 sps:$4 sm:$0xff]  }
  0x60   :  { %v1598_v63 = vld [vmem:[#allocation2 + $0xe4] ss:$16 sps:$4 sm:$0xff]   ;;  %v1601_v1 = vld [vmem:[#allocation2 + $0xec] ss:$16 sps:$4 sm:$0xff]   ;;  %v1596_v2 = vld [vmem:[#allocation2 + $0xe0] ss:$16 sps:$4 sm:$0xff]  }
  0x61   :  { %v1599_v3 = vld [vmem:[#allocation2 + $0xe8] ss:$16 sps:$4 sm:$0xff]   ;;  %v96_v4 = vld [vmem:[%s2107_s0] sm:$0xff]  ;;  %v1607_v9 = vld [vmem:[#allocation5 + $0x10c] ss:$16 sps:$4 sm:$0xff]   ;;  %s1905_s19 = smov [#allocation13]  }
  0x62   :  { %336 = vmatpush1.bf16.msra.mxu0 %v1540_v23  ;;  %377 = vmatpush1.bf16.msra.mxu1 %v1541_v24  ;;  %v97_v5 = vpack.c.bf16 %v96_v4, %v96_v4  ;;  %v1602_v6 = vld [vmem:[#allocation5 + $0x100] ss:$16 sps:$4 sm:$0xff]   ;;  %v1604_v7 = vld [vmem:[#allocation5 + $0x104] ss:$16 sps:$4 sm:$0xff]   ;;  %v1605_v8 = vld [vmem:[#allocation5 + $0x108] ss:$16 sps:$4 sm:$0xff]  }
  0x63   :  { %337 = vmatprep.subr.bf16.mxu0 %v1542_v25  ;;  %378 = vmatprep.subr.bf16.mxu1 %v1544_v26  ;;  %v1610_v10 = vld [vmem:[#allocation5 + $0x124] ss:$16 sps:$4 sm:$0xff]   ;;  %v1613_v11 = vld [vmem:[#allocation5 + $0x12c] ss:$16 sps:$4 sm:$0xff]   ;;  %v1608_v12 = vld [vmem:[#allocation5 + $0x120] ss:$16 sps:$4 sm:$0xff]  }
  0x64   :  { %v1611_v13 = vld [vmem:[#allocation5 + $0x128] ss:$16 sps:$4 sm:$0xff]   ;;  %v1616_v14 = vld [vmem:[#allocation5 + $0x144] ss:$16 sps:$4 sm:$0xff]   ;;  %v1619_v15 = vld [vmem:[#allocation5 + $0x14c] ss:$16 sps:$4 sm:$0xff]  }
  0x65   :  { %v1614_v16 = vld [vmem:[#allocation5 + $0x140] ss:$16 sps:$4 sm:$0xff]   ;;  %v1617_v17 = vld [vmem:[#allocation5 + $0x148] ss:$16 sps:$4 sm:$0xff]   ;;  %v1622_v18 = vld [vmem:[#allocation5 + $0x164] ss:$16 sps:$4 sm:$0xff]  }
  0x66   :  { %338 = vmatpush1.bf16.msra.mxu0 %v1546_v27  ;;  %379 = vmatpush1.bf16.msra.mxu1 %v1547_v28  ;;  %v1625_v19 = vld [vmem:[#allocation5 + $0x16c] ss:$16 sps:$4 sm:$0xff]   ;;  %v1620_v20 = vld [vmem:[#allocation5 + $0x160] ss:$16 sps:$4 sm:$0xff]   ;;  %v1623_v21 = vld [vmem:[#allocation5 + $0x168] ss:$16 sps:$4 sm:$0xff]  }
  0x67   :  { %339 = vmatprep.subr.bf16.mxu0 %v1548_v29  ;;  %380 = vmatprep.subr.bf16.mxu1 %v1550_v30  ;;  %v1628_v22 = vld [vmem:[#allocation5 + $0x184] ss:$16 sps:$4 sm:$0xff]   ;;  %v1626_v23 = vld [vmem:[#allocation5 + $0x180] ss:$16 sps:$4 sm:$0xff]   ;;  %v1631_v24 = vld [vmem:[#allocation5 + $0x18c] ss:$16 sps:$4 sm:$0xff]  }
  0x68   :  { %v1629_v25 = vld [vmem:[#allocation5 + $0x188] ss:$16 sps:$4 sm:$0xff]   ;;  %v1634_v26 = vld [vmem:[#allocation5 + $0x1a4] ss:$16 sps:$4 sm:$0xff]   ;;  %v1632_v27 = vld [vmem:[#allocation5 + $0x1a0] ss:$16 sps:$4 sm:$0xff]  }
  0x69   :  { %v1637_v28 = vld [vmem:[#allocation5 + $0x1ac] ss:$16 sps:$4 sm:$0xff]   ;;  %v1635_v29 = vld [vmem:[#allocation5 + $0x1a8] ss:$16 sps:$4 sm:$0xff]   ;;  %v1640_v30 = vld [vmem:[#allocation5 + $0x1c4] ss:$16 sps:$4 sm:$0xff]  }
  0x6a   :  { %340 = vmatpush1.bf16.msra.mxu0 %v1552_v31  ;;  %381 = vmatpush1.bf16.msra.mxu1 %v1553_v32  ;;  %v1638_v31 = vld [vmem:[#allocation5 + $0x1c0] ss:$16 sps:$4 sm:$0xff]   ;;  %v1643_v32 = vld [vmem:[#allocation5 + $0x1cc] ss:$16 sps:$4 sm:$0xff]   ;;  %v1641_v33 = vld [vmem:[#allocation5 + $0x1c8] ss:$16 sps:$4 sm:$0xff]  }
  0x6b   :  { %567 = vmatprep.subr.bf16.mxu0 %v1556_v34  ;;  %608 = vmatprep.subr.bf16.mxu1 %v1559_v35  ;;  %v1646_v34 = vld [vmem:[#allocation5 + $0x1e4] ss:$16 sps:$4 sm:$0xff]   ;;  %v1644_v35 = vld [vmem:[#allocation5 + $0x1e0] ss:$16 sps:$4 sm:$0xff]   ;;  %s1338_s20 = sshll.u32 %s1905_s19, 4  ;;  %s2053_s20 = int_to_ptr.vmem [resolvable:$true] %s1338_s20 }
  0x6c   :  { %v1694_v4 = vld [vmem:[#allocation2 + $0x1e4] ss:$16 sps:$4 sm:$0xff]  }
  0x6d   :  { %358 = vmatmul.mubr.bf16.vlgmr.msra.gmra.mrb[0].mxu0 %v132_v36  ;;  %399 = vmatmul.mubr.bf16.vlgmr.msra.gmra.mrb[0].mxu1 %v132_v36  ;;  %v1649_v36 = vld [vmem:[#allocation5 + $0x1ec] ss:$16 sps:$4 sm:$0xff]  }
  0x6e   :  { %568 = vmatpush1.bf16.msra.mxu0 %v1554_v37  ;;  %609 = vmatpush1.bf16.msra.mxu1 %v1557_v38  ;;  %v1647_v37 = vld [vmem:[#allocation5 + $0x1e8] ss:$16 sps:$4 sm:$0xff]  }
  0x6f   :  { %569 = vmatprep.subr.bf16.mxu0 %v1562_v39  ;;  %610 = vmatprep.subr.bf16.mxu1 %v1565_v40  ;;  %v89_v38 = vld [vmem:[#allocation7 + $0x8] sm:$0xff]  ;;  %v1652_v40 = vld [vmem:[#allocation2 + $0x104] ss:$16 sps:$4 sm:$0xff]  }
  0x70   :  { %599 = vmatprep.mubr.bf16.mxu0 %v1902_v0  ;;  %640 = vmatprep.mubr.bf16.mxu1 %v1902_v0  ;;  %v739_v39 = vpack.c.bf16 %v89_v38, %v89_v38 }
  0x72   :  { %570 = vmatpush1.bf16.msra.mxu0 %v1560_v41  ;;  %611 = vmatpush1.bf16.msra.mxu1 %v1563_v42  ;;  %v1655_v41 = vld [vmem:[#allocation2 + $0x10c] ss:$16 sps:$4 sm:$0xff]   ;;  %v1650_v42 = vld [vmem:[#allocation2 + $0x100] ss:$16 sps:$4 sm:$0xff]  }
  0x73   :  { %571 = vmatprep.subr.bf16.mxu0 %v1568_v43  ;;  %612 = vmatprep.subr.bf16.mxu1 %v1571_v44  ;;  %v1653_v43 = vld [vmem:[#allocation2 + $0x108] ss:$16 sps:$4 sm:$0xff]   ;;  %v1658_v44 = vld [vmem:[#allocation2 + $0x124] ss:$16 sps:$4 sm:$0xff]  }
  0x76   :  { %572 = vmatpush1.bf16.msra.mxu0 %v1566_v45  ;;  %613 = vmatpush1.bf16.msra.mxu1 %v1569_v46  ;;  %v1661_v45 = vld [vmem:[#allocation2 + $0x12c] ss:$16 sps:$4 sm:$0xff]   ;;  %v1656_v46 = vld [vmem:[#allocation2 + $0x120] ss:$16 sps:$4 sm:$0xff]  }
  0x77   :  { %573 = vmatprep.subr.bf16.mxu0 %v1574_v47  ;;  %614 = vmatprep.subr.bf16.mxu1 %v1577_v48  ;;  %v1659_v47 = vld [vmem:[#allocation2 + $0x128] ss:$16 sps:$4 sm:$0xff]   ;;  %v1664_v48 = vld [vmem:[#allocation2 + $0x144] ss:$16 sps:$4 sm:$0xff]  }
  0x7a   :  { %574 = vmatpush1.bf16.msra.mxu0 %v1572_v49  ;;  %615 = vmatpush1.bf16.msra.mxu1 %v1575_v50  ;;  %v1667_v49 = vld [vmem:[#allocation2 + $0x14c] ss:$16 sps:$4 sm:$0xff]   ;;  %v1662_v50 = vld [vmem:[#allocation2 + $0x140] ss:$16 sps:$4 sm:$0xff]  }
  0x7b   :  { %575 = vmatprep.subr.bf16.mxu0 %v1580_v51  ;;  %616 = vmatprep.subr.bf16.mxu1 %v1583_v52  ;;  %v1665_v51 = vld [vmem:[#allocation2 + $0x148] ss:$16 sps:$4 sm:$0xff]   ;;  %v1670_v52 = vld [vmem:[#allocation2 + $0x164] ss:$16 sps:$4 sm:$0xff]  }
  0x7e   :  { %576 = vmatpush1.bf16.msra.mxu0 %v1578_v53  ;;  %617 = vmatpush1.bf16.msra.mxu1 %v1581_v54  ;;  %v1673_v53 = vld [vmem:[#allocation2 + $0x16c] ss:$16 sps:$4 sm:$0xff]   ;;  %v1668_v54 = vld [vmem:[#allocation2 + $0x160] ss:$16 sps:$4 sm:$0xff]  }
  0x7f   :  { %577 = vmatprep.subr.bf16.mxu0 %v1586_v55  ;;  %618 = vmatprep.subr.bf16.mxu1 %v1589_v56  ;;  %v1671_v55 = vld [vmem:[#allocation2 + $0x168] ss:$16 sps:$4 sm:$0xff]   ;;  %v1679_v56 = vld [vmem:[#allocation2 + $0x18c] ss:$16 sps:$4 sm:$0xff]  }
  0x82   :  { %578 = vmatpush1.bf16.msra.mxu0 %v1584_v57  ;;  %619 = vmatpush1.bf16.msra.mxu1 %v1587_v58  ;;  %v1674_v57 = vld [vmem:[#allocation2 + $0x180] ss:$16 sps:$4 sm:$0xff]   ;;  %v1677_v58 = vld [vmem:[#allocation2 + $0x188] ss:$16 sps:$4 sm:$0xff]  }
  0x83   :  { %579 = vmatprep.subr.bf16.mxu0 %v1592_v59  ;;  %620 = vmatprep.subr.bf16.mxu1 %v1595_v60  ;;  %v1682_v59 = vld [vmem:[#allocation2 + $0x1a4] ss:$16 sps:$4 sm:$0xff]   ;;  %v1680_v60 = vld [vmem:[#allocation2 + $0x1a0] ss:$16 sps:$4 sm:$0xff]  }
  0x86   :  { %580 = vmatpush1.bf16.msra.mxu0 %v1590_v61  ;;  %621 = vmatpush1.bf16.msra.mxu1 %v1593_v62  ;;  %v1685_v61 = vld [vmem:[#allocation2 + $0x1ac] ss:$16 sps:$4 sm:$0xff]   ;;  %v1683_v62 = vld [vmem:[#allocation2 + $0x1a8] ss:$16 sps:$4 sm:$0xff]  }
  0x87   :  { %581 = vmatprep.subr.bf16.mxu0 %v1598_v63  ;;  %622 = vmatprep.subr.bf16.mxu1 %v1601_v1  ;;  %v1688_v63 = vld [vmem:[#allocation2 + $0x1c4] ss:$16 sps:$4 sm:$0xff]   ;;  %v1691_v1 = vld [vmem:[#allocation2 + $0x1cc] ss:$16 sps:$4 sm:$0xff]  }
  0x8a   :  { %582 = vmatpush1.bf16.msra.mxu0 %v1596_v2  ;;  %623 = vmatpush1.bf16.msra.mxu1 %v1599_v3  ;;  %v1686_v2 = vld [vmem:[#allocation2 + $0x1c0] ss:$16 sps:$4 sm:$0xff]   ;;  %v1689_v3 = vld [vmem:[#allocation2 + $0x1c8] ss:$16 sps:$4 sm:$0xff]  }
  0x8b   :  { %933 = vmatprep.subr.bf16.mxu0 %v1604_v7  ;;  %974 = vmatprep.subr.bf16.mxu1 %v1607_v9  ;;  %v1695_v7 = vld [vmem:[#allocation2 + $0x1e8] ss:$16 sps:$4 sm:$0xff]  }
  0x8d   :  { %600 = vmatmul.mubr.bf16.vlgmr.msra.gmra.mrb[4].mxu0 %v97_v5  ;;  %641 = vmatmul.mubr.bf16.vlgmr.msra.gmra.mrb[4].mxu1 %v97_v5  ;;  %v1697_v5 = vld [vmem:[#allocation2 + $0x1ec] ss:$16 sps:$4 sm:$0xff]  }
  0x8e   :  { %965 = vmatprep.mubr.bf16.mxu0 %v1902_v0  ;;  %1006 = vmatprep.mubr.bf16.mxu1 %v1902_v0 }
  0x8f   :  { %934 = vmatpush1.bf16.msra.mxu0 %v1602_v6  ;;  %975 = vmatpush1.bf16.msra.mxu1 %v1605_v8  ;;  %v1692_v6 = vld [vmem:[#allocation2 + $0x1e0] ss:$16 sps:$4 sm:$0xff]  }
  0x90   :  { %935 = vmatprep.subr.bf16.mxu0 %v1610_v10  ;;  %976 = vmatprep.subr.bf16.mxu1 %v1613_v11 }
  0x93   :  { %936 = vmatpush1.bf16.msra.mxu0 %v1608_v12  ;;  %977 = vmatpush1.bf16.msra.mxu1 %v1611_v13 }
  0x94   :  { %937 = vmatprep.subr.bf16.mxu0 %v1616_v14  ;;  %978 = vmatprep.subr.bf16.mxu1 %v1619_v15 }
  0x97   :  { %938 = vmatpush1.bf16.msra.mxu0 %v1614_v16  ;;  %979 = vmatpush1.bf16.msra.mxu1 %v1617_v17  ;;  %v651_v16 = vlaneseq }
  0x98   :  { %939 = vmatprep.subr.bf16.mxu0 %v1622_v18  ;;  %980 = vmatprep.subr.bf16.mxu1 %v1625_v19  ;;  %v649_v19 = vld [vmem:[%s2110_s3] sm:$0xf] }
  0x99   :  { %v2023_v17 = vshrl.u32 %v651_v16, 7 }
  0x9b   :  { %940 = vmatpush1.bf16.msra.mxu0 %v1620_v20  ;;  %981 = vmatpush1.bf16.msra.mxu1 %v1623_v21  ;;  %v653_v18 = vsub.s32 0, %v2023_v17  ;;  %v657_v20 = vsub.s32 1, %v2023_v17 }
  0x9c   :  { %941 = vmatprep.subr.bf16.mxu0 %v1628_v22  ;;  %982 = vmatprep.subr.bf16.mxu1 %v1631_v24 }
  0x9d   :  { %v654_v21 = vrot.slane %v649_v19, %v653_v18  ;;  %v658_v24 = vrot.slane %v649_v19, %v657_v20 }
  0x9f   :  { %942 = vmatpush1.bf16.msra.mxu0 %v1626_v23  ;;  %983 = vmatpush1.bf16.msra.mxu1 %v1629_v25 }
  0xa0   :  { %943 = vmatprep.subr.bf16.mxu0 %v1634_v26  ;;  %984 = vmatprep.subr.bf16.mxu1 %v1637_v28 }
  0xa3   :  { %944 = vmatpush1.bf16.msra.mxu0 %v1632_v27  ;;  %985 = vmatpush1.bf16.msra.mxu1 %v1635_v29 }
  0xa4   :  { %945 = vmatprep.subr.bf16.mxu0 %v1640_v30  ;;  %986 = vmatprep.subr.bf16.mxu1 %v1643_v32 }
  0xa7   :  { %946 = vmatpush1.bf16.msra.mxu0 %v1638_v31  ;;  %987 = vmatpush1.bf16.msra.mxu1 %v1641_v33  ;;  %v665_v31 = vsub.s32 3, %v2023_v17 }
  0xa8   :  { %947 = vmatprep.subr.bf16.mxu0 %v1646_v34  ;;  %988 = vmatprep.subr.bf16.mxu1 %v1649_v36 }
  0xab   :  { %948 = vmatpush1.bf16.msra.mxu0 %v1644_v35  ;;  %989 = vmatpush1.bf16.msra.mxu1 %v1647_v37 }
  0xac   :  { %1175 = vmatprep.subr.bf16.mxu0 %v1652_v40  ;;  %1216 = vmatprep.subr.bf16.mxu1 %v1655_v41  ;;  %v666_v40 = vrot.slane %v649_v19, %v665_v31  ;;  %v661_v41 = vsub.s32 2, %v2023_v17 }
  0xae   :  { %966 = vmatmul.mubr.bf16.vlgmr.msra.gmra.mrb[8].mxu0 %v739_v39  ;;  %1007 = vmatmul.mubr.bf16.vlgmr.msra.gmra.mrb[8].mxu1 %v739_v39 }
  0xaf   :  { %1207 = vmatprep.mubr.bf16.mxu0 %v1902_v0  ;;  %1176 = vmatpush1.bf16.msra.mxu0 %v1650_v42 }
  0xb0   :  { %1217 = vmatpush1.bf16.msra.mxu1 %v1653_v43  ;;  %1248 = vmatprep.mubr.bf16.mxu1 %v1902_v0  ;;  %v1676_v0 = vld [vmem:[#allocation2 + $0x184] ss:$16 sps:$4 sm:$0xff]   ;;  %v662_v43 = vrot.slane %v649_v19, %v661_v41 }
  0xb1   :  { %1177 = vmatprep.subr.bf16.mxu0 %v1658_v44  ;;  %1218 = vmatprep.subr.bf16.mxu1 %v1661_v45 }
  0xb3   :  { %1178 = vmatpush1.bf16.msra.mxu0 %v1656_v46 }
  0xb4   :  { %1219 = vmatpush1.bf16.msra.mxu1 %v1659_v47  ;;  %1179 = vmatprep.subr.bf16.mxu0 %v1664_v48 }
  0xb5   :  { %1220 = vmatprep.subr.bf16.mxu1 %v1667_v49 }
  0xb7   :  { %1180 = vmatpush1.bf16.msra.mxu0 %v1662_v50 }
  0xb8   :  { %1221 = vmatpush1.bf16.msra.mxu1 %v1665_v51  ;;  %1181 = vmatprep.subr.bf16.mxu0 %v1670_v52  ;;  %v92_v52 = vld [vmem:[#allocation8] sm:$0xff] }
  0xb9   :  { %1222 = vmatprep.subr.bf16.mxu1 %v1673_v53 }
  0xbb   :  { %1182 = vmatpush1.bf16.msra.mxu0 %v1668_v54 }
  0xbc   :  { %1223 = vmatpush1.bf16.msra.mxu1 %v1671_v55  ;;  %1183 = vmatprep.subr.bf16.mxu0 %v1676_v0 }
  0xbd   :  { %1224 = vmatprep.subr.bf16.mxu1 %v1679_v56 }
  0xbf   :  { %1184 = vmatpush1.bf16.msra.mxu0 %v1674_v57 }
  0xc0   :  { %1225 = vmatpush1.bf16.msra.mxu1 %v1677_v58  ;;  %1185 = vmatprep.subr.bf16.mxu0 %v1682_v59 }
  0xc1   :  { %1226 = vmatprep.subr.bf16.mxu1 %v1685_v61 }
  0xc3   :  { %1186 = vmatpush1.bf16.msra.mxu0 %v1680_v60 }
  0xc4   :  { %1227 = vmatpush1.bf16.msra.mxu1 %v1683_v62  ;;  %1187 = vmatprep.subr.bf16.mxu0 %v1688_v63 }
  0xc5   :  { %1228 = vmatprep.subr.bf16.mxu1 %v1691_v1 }
  0xc7   :  { %1188 = vmatpush1.bf16.msra.mxu0 %v1686_v2 }
  0xc8   :  { %1229 = vmatpush1.bf16.msra.mxu1 %v1689_v3  ;;  %1189 = vmatprep.subr.bf16.mxu0 %v1694_v4 }
  0xc9   :  { %1230 = vmatprep.subr.bf16.mxu1 %v1697_v5 }
  0xcb   :  { %1190 = vmatpush1.bf16.msra.mxu0 %v1692_v6 }
  0xcc   :  { %1231 = vmatpush1.bf16.msra.mxu1 %v1695_v7  ;;  %v1490_v7 = vld [vmem:[%s2110_s3 + $0x4] sm:$0xf]  ;;  %s1903_s3 = smov [#allocation11]  }
  0xcd   :  { %s1326_s14 = sshll.u32 %s1903_s3, 4  ;;  %s1327_s14 = int_to_ptr.vmem [resolvable:$true] %s1326_s14 }
  0xce   :  { %s1818_s17 = scalar_lea.vmem %s1327_s14, 256  ;;  %p1823_p5 = scmp.lt.s32.totalorder %s1327_s14, %s1327_s14 }
  0xcf   :  { %p1819_p4 = scmp.ne.s32.totalorder %s1327_s14, %s1818_s17  ;;  %p1824_p6 = scmp.lt.s32.totalorder %s1818_s17, %s1818_s17 }
  0xd1   :  { %p1825_p7 = por %p1824_p6, %p1823_p5 }
  0xd3   :  { %p1826_p8 = pnand %p1825_p7, %p1819_p4 }
 0x140   :  { %v359_v8 = vpop.f32.mrb[0].mxu0  ;;  %v400_v9 = vpop.f32.mrb[0].mxu1 }
 0x141   :  { %v361_v10 = vpop.f32.mrb[1].mxu0  ;;  %v402_v11 = vpop.f32.mrb[1].mxu1 }
 0x142   :  { %v363_v12 = vpop.f32.mrb[2].mxu0  ;;  %v404_v13 = vpop.f32.mrb[2].mxu1 }
 0x143   :  { %v364_v14 = vpop.f32.mrb[3].mxu0  ;;  %v405_v15 = vpop.f32.mrb[3].mxu1 }
 0x160   :  { %v601_v22 = vpop.f32.mrb[4].mxu0  ;;  %v642_v23 = vpop.f32.mrb[4].mxu1 }
 0x161   :  { %v602_v25 = vadd.f32 %v601_v22, %v359_v8  ;;  %v643_v26 = vadd.f32 %v642_v23, %v400_v9  ;;  %v603_v27 = vpop.f32.mrb[5].mxu0  ;;  %v644_v28 = vpop.f32.mrb[5].mxu1  ;;  %v1263_v8 = vrot.slane %v1490_v7, %v653_v18  ;;  %v1275_v18 = vrot.slane %v1490_v7, %v665_v31 }
 0x162   :  { %v604_v29 = vadd.f32 %v603_v27, %v361_v10  ;;  %v645_v30 = vadd.f32 %v644_v28, %v402_v11  ;;  %v605_v32 = vpop.f32.mrb[6].mxu0  ;;  %v646_v33 = vpop.f32.mrb[6].mxu1  ;;  %v1267_v11 = vrot.slane %v1490_v7, %v657_v20 }
 0x163   :  { %v671_v34 = vadd.f32 %v654_v21, %v602_v25  ;;  %v606_v35 = vpop.f32.mrb[7].mxu0  ;;  %v647_v36 = vpop.f32.mrb[7].mxu1  ;;  %v673_v45 = vadd.f32 %v662_v43, %v643_v26 }
 0x164   :  { %v672_v37 = vadd.f32 %v658_v24, %v604_v29  ;;  %v674_v42 = vadd.f32 %v666_v40, %v645_v30  ;;  %v1271_v29 = vrot.slane %v1490_v7, %v661_v41 }
 0x165   :  { %v1423_v38 = vmul.f32 -1.442695, %v671_v34 }
 0x166   :  { %v1424_v39 = vmul.f32 -1.442695, %v672_v37  ;;  %v1425_v44 = vmul.f32 -1.442695, %v674_v42 }
 0x167   :  { %1698 = vpow2.f32 %v1423_v38 }
 0x168   :  { %1700 = vpow2.f32 %v1424_v39  ;;  %v93_v39 = vld [vmem:[#allocation8 + $0x8] sm:$0xff] }
 0x169   :  { %1702 = vpow2.f32 %v1425_v44 }
 0x16a   :  { %1704 = vtanh.f32 %v673_v45 }
 0x171   :  { %v1699_v46 = vpop.eup %1698 }
 0x172   :  { %v1701_v47 = vpop.eup %1700  ;;  %v678_v48 = vadd.f32 1.0, %v1699_v46 }
 0x173   :  { %v684_v49 = vadd.f32 1.0, %v1701_v47  ;;  %v1703_v50 = vpop.eup %1702 }
 0x174   :  { %1706 = vrcp.f32 %v678_v48  ;;  %v1705_v51 = vpop.eup %1704  ;;  %v691_v0 = vadd.f32 1.0, %v1703_v50 }
 0x175   :  { %1708 = vrcp.f32 %v684_v49 }
 0x176   :  { %1710 = vrcp.f32 %v691_v0 }
 0x17e   :  { %v1707_v53 = vpop.eup %1706 }
 0x17f   :  { %v1709_v54 = vpop.eup %1708  ;;  %v695_v55 = vmul.f32 %v1707_v53, %v1705_v51 }
 0x180   :  { %v694_v56 = vmul.f32 %v1709_v54, %v92_v52  ;;  %v1711_v58 = vpop.eup %1710 }
 0x181   :  { %v967_v62 = vpop.f32.mrb[8].mxu0  ;;  %v1008_v3 = vpop.f32.mrb[8].mxu1 }
 0x182   :  { %v696_v57 = vadd.f32 %v695_v55, %v694_v56  ;;  %v969_v63 = vpop.f32.mrb[9].mxu0  ;;  %v1010_v4 = vpop.f32.mrb[9].mxu1 }
 0x183   :  { %v971_v1 = vpop.f32.mrb[10].mxu0  ;;  %v1012_v5 = vpop.f32.mrb[10].mxu1 }
 0x184   :  { %700 = vst [vmem:[#allocation13] sm:$0xff] %v696_v57  ;;  %1712 = vtanh.f32 %v696_v57  ;;  %v972_v2 = vpop.f32.mrb[11].mxu0  ;;  %v1013_v6 = vpop.f32.mrb[11].mxu1 }
 0x18e   :  { %v1713_v59 = vpop.eup %1712 }
 0x18f   :  { %v698_v60 = vmul.f32 %v1713_v59, %v1711_v58 }
 0x191   :  { %v701_v61 = vpack.c.bf16 %v698_v60, %v698_v60  ;;  %699 = vst [vmem:[#allocation11] sm:$0xff] %v698_v60 }
 0x193   :  { %1208 = vmatmul.mubr.bf16.vlgmr.msra.gmra.mrb[12].mxu0 %v701_v61  ;;  %1249 = vmatmul.mubr.bf16.vlgmr.msra.gmra.mrb[12].mxu1 %v701_v61 }
 0x266   :  { %v1209_v9 = vpop.f32.mrb[12].mxu0  ;;  %v1250_v10 = vpop.f32.mrb[12].mxu1 }
 0x267   :  { %v1210_v12 = vadd.f32 %v1209_v9, %v967_v62  ;;  %v1251_v13 = vadd.f32 %v1250_v10, %v1008_v3  ;;  %v1211_v14 = vpop.f32.mrb[13].mxu0  ;;  %v1252_v15 = vpop.f32.mrb[13].mxu1 }
 0x268   :  { %v1212_v16 = vadd.f32 %v1211_v14, %v969_v63  ;;  %v1253_v19 = vadd.f32 %v1252_v15, %v1010_v4  ;;  %v1213_v21 = vpop.f32.mrb[14].mxu0  ;;  %v1254_v22 = vpop.f32.mrb[14].mxu1 }
 0x269   :  { %v1280_v23 = vadd.f32 %v1263_v8, %v1210_v12  ;;  %v1214_v24 = vpop.f32.mrb[15].mxu0  ;;  %v1255_v25 = vpop.f32.mrb[15].mxu1  ;;  %v1282_v32 = vadd.f32 %v1271_v29, %v1251_v13 }
 0x26a   :  { %v1281_v26 = vadd.f32 %v1267_v11, %v1212_v16  ;;  %v1283_v20 = vadd.f32 %v1275_v18, %v1253_v19 }
 0x26b   :  { %v1491_v27 = vmul.f32 -1.442695, %v1280_v23 }
 0x26c   :  { %v1492_v28 = vmul.f32 -1.442695, %v1281_v26  ;;  %v1493_v30 = vmul.f32 -1.442695, %v1283_v20 }
 0x26d   :  { %1714 = vpow2.f32 %v1491_v27 }
 0x26e   :  { %1716 = vpow2.f32 %v1492_v28 }
 0x26f   :  { %1718 = vpow2.f32 %v1493_v30 }
 0x270   :  { %1720 = vtanh.f32 %v1282_v32 }
 0x277   :  { %v1715_v33 = vpop.eup %1714 }
 0x278   :  { %v1717_v34 = vpop.eup %1716  ;;  %v1287_v35 = vadd.f32 1.0, %v1715_v33 }
 0x279   :  { %v1293_v36 = vadd.f32 1.0, %v1717_v34  ;;  %v1719_v37 = vpop.eup %1718 }
 0x27a   :  { %1722 = vrcp.f32 %v1287_v35  ;;  %v1721_v38 = vpop.eup %1720  ;;  %v1300_v43 = vadd.f32 1.0, %v1719_v37 }
 0x27b   :  { %1724 = vrcp.f32 %v1293_v36 }
 0x27c   :  { %1726 = vrcp.f32 %v1300_v43 }
 0x284   :  { %v1723_v31 = vpop.eup %1722 }
 0x285   :  { %v1725_v40 = vpop.eup %1724  ;;  %v1304_v42 = vmul.f32 %v1723_v31, %v1721_v38 }
 0x286   :  { %v1303_v44 = vmul.f32 %v1725_v40, %v93_v39  ;;  %v1727_v41 = vpop.eup %1726 }
 0x288   :  { %v1305_v17 = vadd.f32 %v1304_v42, %v1303_v44 }
 0x28a   :  { %1728 = vtanh.f32 %v1305_v17  ;;  %1309 = vst [vmem:[#allocation13 + $0x8] sm:$0xff] %v1305_v17 }
 0x294   :  { %v1729_v45 = vpop.eup %1728 }
 0x295   :  { %v1307_v46 = vmul.f32 %v1729_v45, %v1727_v41 }
 0x297   :  { %1308 = vst [vmem:[#allocation11 + $0x8] sm:$0xff] %v1307_v46  ;;  %1310 = vst [vmem:[#allocation10] sm:$0xff] %v1307_v46 }
 0x298   :  { %1829 = shalt.err (!%p1826_p8)
}
 0x299   :  { %s1830_s22 = scalar_lea.hbm %s2114_s7, 256 }
 0x29a   :  { %p1831_p9 = scmp.ne.s32.totalorder %s2114_s7, %s1830_s22  ;;  %p1834_p10 = scmp.lt.u32.totalorder %s1830_s22, %s2114_s7 }
 0x29c   :  { %p1836_p11 = pnand %p1834_p10, %p1831_p9 }
 0x29e   :  { %1839 = shalt.err (!%p1836_p11)
}
 0x29f   :  { %1332 = dma.vmem_to_hbm [thread:$0]  %s1327_s14, 256, %s2114_s7, [#allocation12], %s1899_s1, %s1899_s1, %s1900_s30  }
 0x2a0   :  { %s1840_s2 = scalar_lea.vmem %s2051_s16, 128  ;;  %p1845_p13 = scmp.lt.s32.totalorder %s2051_s16, %s2051_s16 }
 0x2a1   :  { %p1841_p12 = scmp.ne.s32.totalorder %s2051_s16, %s1840_s2  ;;  %p1846_p0 = scmp.lt.s32.totalorder %s1840_s2, %s1840_s2 }
 0x2a3   :  { %p1847_p1 = por %p1846_p0, %p1845_p13 }
 0x2a5   :  { %p1848_p2 = pnand %p1847_p1, %p1841_p12 }
 0x2a7   :  { %1851 = shalt.err (!%p1848_p2)
}
 0x2a8   :  { %s1852_s9 = scalar_lea.hbm %s2113_s6, 128 }
 0x2a9   :  { %p1853_p3 = scmp.ne.s32.totalorder %s2113_s6, %s1852_s9  ;;  %p1856_p4 = scmp.lt.u32.totalorder %s1852_s9, %s2113_s6 }
 0x2ab   :  { %p1858_p5 = pnand %p1856_p4, %p1853_p3 }
 0x2ad   :  { %1861 = shalt.err (!%p1858_p5)
}
 0x2ae   :  { %1320 = dma.vmem_to_hbm [thread:$0]  %s2051_s16, 128, %s2113_s6, [#allocation4]  }
 0x2af   :  { %s1862_s13 = scalar_lea.vmem %s2053_s20, 256  ;;  %p1867_p7 = scmp.lt.s32.totalorder %s2053_s20, %s2053_s20 }
 0x2b0   :  { %p1863_p6 = scmp.ne.s32.totalorder %s2053_s20, %s1862_s13  ;;  %p1868_p8 = scmp.lt.s32.totalorder %s1862_s13, %s1862_s13 }
 0x2b2   :  { %p1869_p9 = por %p1868_p8, %p1867_p7 }
 0x2b4   :  { %p1870_p10 = pnand %p1869_p9, %p1863_p6 }
 0x2b6   :  { %1873 = shalt.err (!%p1870_p10)
}
 0x2b7   :  { %s1874_s15 = scalar_lea.hbm %s2115_s8, 256 }
 0x2b8   :  { %p1875_p11 = scmp.ne.s32.totalorder %s2115_s8, %s1874_s15  ;;  %p1878_p12 = scmp.lt.u32.totalorder %s1874_s15, %s2115_s8 }
 0x2ba   :  { %p1880_p13 = pnand %p1878_p12, %p1875_p11 }
 0x2bc   :  { %1883 = shalt.err (!%p1880_p13)
}
 0x2bd   :  { %1344 = dma.vmem_to_hbm [thread:$0]  %s2053_s20, 256, %s2115_s8, [#allocation12], %s1899_s1, %s1899_s1, %s1900_s30  }
 0x2be   :  { %1890 = dma.done.wait [#allocation4], 128  }
 0x2bf   :  { %1891 = vsyncadd [#allocation4], 4294967168 }
 0x2c0   :  { %1892 = dma.done.wait [#allocation12], 512  }
 0x2c1   :  { %1893 = vsyncadd [#allocation12], 4294966784 }
 0x2c2   :  { %1354 = vsyncpa [#allocation3], 1 }
 0x2c3   :  { %1355 = vsyncpa [#allocation6], 1 }
 0x2c4   :  { %1356 = vsyncpa [#allocation9], 1 }
 0x2c5   :  { %1357 = vsyncpa [#allocation4], 1 }
 0x2c6   :  { %1358 = vsyncpa [#allocation12], 1 }

</bundles_post_ra>
